<compile_context>
chip_gen: v5e
topology: v5e:2x2
jax: 0.10.0
libtpu: 0.0.40
codegen_flags: <defaults>
</compile_context>

<pallas_src>
import math

import jax
import jax.numpy as jnp
from jax.experimental import pallas as pl
from jax.experimental.pallas import tpu as pltpu


# ----------------------------- kernel ---------------------------------------

def patch_embed_kernel(patches_ref, w_ref, pos_ref, out_ref):
    # patches_ref: (bt*(N+1), Ppad) bf16  -- row 0 of each sample is zeros (CLS slot)
    # w_ref:       (Ppad, E)        bf16  -- Conv2d weight, (c, kh, kw) flattened
    # pos_ref:     (bt*(N+1), E)    f32   -- per-block fused (cls+pos0 / pos+bias)
    # out_ref:     (bt*(N+1), E)    bf16
    acc = jnp.dot(patches_ref[...], w_ref[...],
                  preferred_element_type=jnp.float32)      # MXU, f32 accumulate
    out_ref[...] = (acc + pos_ref[...]).astype(out_ref.dtype)  # one lane-dense store
    # Dropout(p) -> identity (inference semantics).


# ----------------------------- tiling helpers --------------------------------

def _vmem_budget_bytes():
    """~75% of this chip's physical VMEM; conservative 48 MiB fallback (v7x)."""
    try:
        info = pltpu.get_tpu_info()
        cap = getattr(info, "vmem_capacity_bytes", None)
        if cap:
            return int(cap) * 3 // 4
    except Exception:
        pass
    return 48 * 1024 * 1024


def _pick_batch_tile(batch, rows_per_sample, p_pad, embed_dim, out_itemsize,
                     budget):
    """Largest batch tile whose working set fits the per-core VMEM budget."""
    def need(bt):
        rows = bt * rows_per_sample
        return (2 * rows * p_pad * 2               # patches (bf16, double-buffered)
                + 2 * rows * embed_dim * out_itemsize  # output (double-buffered)
                + rows * embed_dim * 4             # fused pos tile (f32, const block)
                + rows * embed_dim * 4             # f32 matmul result before cast
                + p_pad * embed_dim * 2)           # weight (bf16, const block)

    bt = batch
    while bt > 1 and need(bt) > budget:
        bt -= 1
    if bt >= batch:
        return batch                               # single full-extent block: always legal
    # Sub-batch blocks must keep the row axis sublane-aligned (bf16 tile = 16).
    align = 16 // math.gcd(rows_per_sample, 16)
    bt = max((bt // align) * align, align)
    return min(bt, batch)


# ----------------------------- wrapper ---------------------------------------

def patch_embedding(x, params, *, patch_size, out_dtype=jnp.bfloat16):
    B, C, H, W = x.shape
    p = patch_size
    assert H % p == 0 and W % p == 0, "H and W must be divisible by patch_size"
    Hp, Wp = H // p, W // p
    N = Hp * Wp
    P = C * p * p
    E = params['conv_w'].shape[0]
    assert params['pos'].shape[1] == N + 1, "num_patches mismatch with input size"

    rows_per_sample = N + 1                        # CLS slot + N patch tokens
    P_pad = ((P + 127) // 128) * 128               # lane-dense K for MXU / DMAs

    # --- glue (candidate for allow_input_fusion into the pallas_call DMA) ----
    patches = (x.reshape(B, C, Hp, p, Wp, p)
                .transpose(0, 2, 4, 1, 3, 5)       # (B, Hp, Wp, C, p, p)
                .reshape(B, N, P)
                .astype(jnp.bfloat16))
    # Prepend a zero row per sample (CLS slot) and zero-pad the feature dim.
    patches = jnp.pad(patches, ((0, 0), (1, 0), (0, P_pad - P)))

    # Fold Conv2d bias into the patch-token positional rows; precompute cls+pos0.
    pos = params['pos'][0]                                         # (N+1, E) f32
    cls_row = params['cls'][0, 0][None, :] + pos[0:1, :]           # (1, E)
    pos_fused = jnp.concatenate(
        [cls_row, pos[1:, :] + params['conv_b'][None, :]], axis=0)  # (N+1, E)

    # Conv2d weight (E, C, p, p) -> (P, E), (c, kh, kw) order, bf16, K-padded.
    w = params['conv_w'].reshape(E, P).T.astype(jnp.bfloat16)
    w = jnp.pad(w, ((0, P_pad - P), (0, 0)))

    # --- VMEM-budget-driven batch tile, pad B so it never degrades to bt=1 ---
    out_itemsize = jnp.dtype(out_dtype).itemsize
    vmem_budget = _vmem_budget_bytes()
    bt = _pick_batch_tile(B, rows_per_sample, P_pad, E, out_itemsize, vmem_budget)
    B_pad = pl.cdiv(B, bt) * bt
    if B_pad != B:
        patches = jnp.pad(patches, ((0, B_pad - B), (0, 0), (0, 0)))
    patches = patches.reshape(B_pad * rows_per_sample, P_pad)

    rows = bt * rows_per_sample
    pos_tile = jnp.tile(pos_fused, (bt, 1))                        # (rows, E) f32

    out2d = pl.pallas_call(
        patch_embed_kernel,
        out_shape=jax.ShapeDtypeStruct((B_pad * rows_per_sample, E), out_dtype),
        grid=(B_pad // bt,),
        in_specs=[
            pl.BlockSpec((rows, P_pad), lambda i: (i, 0)),   # folded token rows
            pl.BlockSpec((P_pad, E), lambda i: (0, 0)),      # projection weight
            pl.BlockSpec((rows, E), lambda i: (0, 0)),       # fused pos (constant)
        ],
        out_specs=pl.BlockSpec((rows, E), lambda i: (i, 0)),
        compiler_params=pltpu.CompilerParams(
            dimension_semantics=("parallel",),               # megacore / v7x 2 TCs
            vmem_limit_bytes=int(vmem_budget),
            allow_input_fusion=[True, False, False],         # fuse patch glue into DMA
        ),
    )(patches, w, pos_tile)

    # Free metadata reshape outside the kernel; drop batch padding.
    return out2d.reshape(B_pad, rows_per_sample, E)[:B]


# ----------------------------- params / reference ----------------------------

def init_params(key, *, embed_dim, patch_size, num_patches, in_channels):
    E, p, C = embed_dim, patch_size, in_channels
    P = C * p * p
    k_w, k_b, k_cls, k_pos = jax.random.split(key, 4)
    bound = 1.0 / (P ** 0.5)                       # PyTorch Conv2d default init
    return {
        'conv_w': jax.random.uniform(k_w, (E, C, p, p), jnp.float32, -bound, bound),
        'conv_b': jax.random.uniform(k_b, (E,), jnp.float32, -bound, bound),
        'cls': jax.random.normal(k_cls, (1, 1, E), jnp.float32),
        'pos': jax.random.normal(k_pos, (1, num_patches + 1, E), jnp.float32),
    }


def patch_embedding_ref(x, params, *, patch_size):
    """Pure-JAX reference (same bf16 operand rounding as the kernel, f32 out)."""
    B, C, H, W = x.shape
    p = patch_size
    Hp, Wp = H // p, W // p
    E = params['conv_w'].shape[0]
    patches = (x.reshape(B, C, Hp, p, Wp, p)
                .transpose(0, 2, 4, 1, 3, 5)
                .reshape(B, Hp * Wp, C * p * p)
                .astype(jnp.bfloat16).astype(jnp.float32))
    w = params['conv_w'].reshape(E, -1).T.astype(jnp.bfloat16).astype(jnp.float32)
    emb = jnp.einsum('bnp,pe->bne', patches, w) + params['conv_b']
    cls = jnp.broadcast_to(params['cls'], (B, 1, E))
    seq = jnp.concatenate([cls, emb], axis=1)
    return seq + params['pos']


# ----------------------------- main ------------------------------------------

if __name__ == "__main__":
    B, C, H, W = 2, 4, 16, 16
    patch_size = 4
    num_patches = (H // patch_size) * (W // patch_size)   # 16
    embed_dim = 128          # multiple of 128 -> lane-dense output stores

    key = jax.random.PRNGKey(0)
    kx, kp = jax.random.split(key)
    x = jax.random.normal(kx, (B, C, H, W), jnp.float32)
    params = init_params(kp, embed_dim=embed_dim, patch_size=patch_size,
                         num_patches=num_patches, in_channels=C)

    out = patch_embedding(x, params, patch_size=patch_size)
    out = jax.block_until_ready(out)

    assert out.shape == (B, num_patches + 1, embed_dim), out.shape
    out_f32 = out.astype(jnp.float32)
    assert bool(jnp.all(jnp.isfinite(out_f32)))

    ref = patch_embedding_ref(x, params, patch_size=patch_size)
    max_err = float(jnp.max(jnp.abs(out_f32 - ref)))
    assert max_err < 6e-2, f"max abs error vs reference: {max_err}"

    print("KERNEL_OK")
</pallas_src>

<mosaic_0001>
module attributes {stable_mosaic.version = 11 : i64} {
  func.func @patch_embed_kernel(%arg0: i32, %arg1: memref<34x128xbf16, #tpu.memory_space<vmem>>, %arg2: memref<128x128xbf16, #tpu.memory_space<vmem>>, %arg3: memref<34x128xf32, #tpu.memory_space<vmem>>, %arg4: memref<34x128xbf16, #tpu.memory_space<vmem>>) attributes {dimension_semantics = [#tpu.dimension_semantics<parallel>], iteration_bounds = array<i64: 1>, scalar_prefetch = 0 : i64, scratch_operands = 0 : i64, tpu.core_type = #tpu.core_type<tc>, window_params = [{transform_indices = @transform_0, window_bounds = array<i64: 34, 128>}, {pipeline_mode = #tpu.pipeline_mode<synchronous>, transform_indices = @transform_1, window_bounds = array<i64: 128, 128>}, {pipeline_mode = #tpu.pipeline_mode<synchronous>, transform_indices = @transform_2, window_bounds = array<i64: 34, 128>}, {transform_indices = @transform_3, window_bounds = array<i64: 34, 128>}]} {
    %c0 = arith.constant 0 : index
    %c0_0 = arith.constant 0 : index
    %0 = vector.load %arg1[%c0, %c0_0] : memref<34x128xbf16, #tpu.memory_space<vmem>>, vector<34x128xbf16>
    %c0_1 = arith.constant 0 : index
    %c0_2 = arith.constant 0 : index
    %1 = vector.load %arg2[%c0_1, %c0_2] : memref<128x128xbf16, #tpu.memory_space<vmem>>, vector<128x128xbf16>
    %cst = arith.constant dense<0.000000e+00> : vector<34x128xf32>
    %2 = tpu.matmul %0, %1, %cst {dimension_numbers = #tpu.dot_dimension_numbers<[1], [0], [0], [1], [0, 0, 1, 1], [], []>} : vector<34x128xbf16>, vector<128x128xbf16>, vector<34x128xf32> -> vector<34x128xf32>
    %c0_3 = arith.constant 0 : index
    %c0_4 = arith.constant 0 : index
    %3 = vector.load %arg3[%c0_3, %c0_4] : memref<34x128xf32, #tpu.memory_space<vmem>>, vector<34x128xf32>
    %4 = arith.addf %2, %3 : vector<34x128xf32>
    %5 = arith.truncf %4 : vector<34x128xf32> to vector<34x128xbf16>
    %c0_5 = arith.constant 0 : index
    %c0_6 = arith.constant 0 : index
    %6 = vector.load %arg4[%c0_5, %c0_6] : memref<34x128xbf16, #tpu.memory_space<vmem>>, vector<34x128xbf16>
    tpu.vector_store %arg4[%c0_5, %c0_6], %5 {strides = array<i32>} : memref<34x128xbf16, #tpu.memory_space<vmem>>, vector<34x128xbf16>,
    return
  }
  func.func @transform_0(%arg0: i32) -> (i32, i32) {
    %c0_i32 = arith.constant 0 : i32
    %c0_i32_0 = arith.constant 0 : i32
    return %arg0, %c0_i32 : i32, i32
  }
  func.func @transform_1(%arg0: i32) -> (i32, i32) {
    %c0_i32 = arith.constant 0 : i32
    %c0_i32_0 = arith.constant 0 : i32
    %c0_i32_1 = arith.constant 0 : i32
    return %c0_i32, %c0_i32_0 : i32, i32
  }
  func.func @transform_2(%arg0: i32) -> (i32, i32) {
    %c0_i32 = arith.constant 0 : i32
    %c0_i32_0 = arith.constant 0 : i32
    %c0_i32_1 = arith.constant 0 : i32
    return %c0_i32, %c0_i32_0 : i32, i32
  }
  func.func @transform_3(%arg0: i32) -> (i32, i32) {
    %c0_i32 = arith.constant 0 : i32
    %c0_i32_0 = arith.constant 0 : i32
    return %arg0, %c0_i32 : i32, i32
  }
}

</mosaic_0001>

<bundles_post_ra>
// kernel: tpu_custom_call.1
= control target key start
LH: loop header
LB: loop body
LE: loop exit
PB: predicated region body
PF: predicated region fallthrough
CT: control target
= control target key end

     0   :  { %8 = vsyncpa [#allocation3], 0  ;;  %s441_s0 = inlined_call_operand.hbm [shape: bf16[34,128], index: 0, kind: input, shape index: {}]   ;;  %s442_s1 = inlined_call_operand.hbm [shape: bf16[128,128], index: 1, kind: input, shape index: {}]   ;;  %s443_s2 = inlined_call_operand.hbm [shape: f32[34,128], index: 2, kind: input, shape index: {}]   ;;  %s444_s3 = inlined_call_operand.hbm [shape: bf16[34,128], index: 3, kind: output, shape index: {}]  }
   0x1   :  { %9 = vsyncpa [#allocation6], 0 }
   0x2   :  { %10 = vsyncpa [#allocation4], 0  ;;  %s28_s14 = sshll.u32 %s442_s1, 4  ;;  %s392_s15 = smov [#allocation5]   ;;  %s29_s14 = int_to_ptr.hbm [resolvable:$true] %s28_s14 }
   0x3   :  { %s30_s16 = sshll.u32 %s392_s15, 4  ;;  %s15_s19 = sshll.u32 %s441_s0, 4  ;;  %s31_s16 = int_to_ptr.vmem [resolvable:$true] %s30_s16  ;;  %s16_s19 = int_to_ptr.hbm [resolvable:$true] %s15_s19 }
   0x4   :  { %s393_s20 = smov 64   ;;  %s394_s21 = smov 4  }
   0x5   :  { %36 = dma.hbm_to_vmem [thread:$0]  %s29_s14, 1024, %s31_s16, [#allocation6], %s393_s20, %s393_s20, %s394_s21  }
   0x6   :  { %s395_s22 = smov [#allocation2]   ;;  %s41_s1 = sshll.u32 %s443_s2, 4  ;;  %s42_s1 = int_to_ptr.hbm [resolvable:$true] %s41_s1 }
   0x7   :  { %s17_s23 = sshll.u32 %s395_s22, 4  ;;  %s396_s0 = smov [#allocation7]   ;;  %s18_s23 = int_to_ptr.vmem [resolvable:$true] %s17_s23 }
   0x8   :  { %23 = dma.hbm_to_vmem [thread:$0]  %s16_s19, 320, %s18_s23, [#allocation3], %s393_s20, %s393_s20, %s394_s21  }
   0x9   :  { %s43_s26 = sshll.u32 %s396_s0, 4  ;;  %s397_s27 = smov 128   ;;  %s44_s26 = int_to_ptr.vmem [resolvable:$true] %s43_s26 }
   0xa   :  { %s398_s28 = smov 8  }
   0xb   :  { %49 = dma.hbm_to_vmem [thread:$0]  %s42_s1, 640, %s44_s26, [#allocation6], %s397_s27, %s397_s27, %s398_s28  }
   0xc   :  { %386 = dma.done.wait [#allocation3], 320  }
   0xd   :  { %387 = vsyncadd [#allocation3], 4294966976 }
   0xe   :  { %388 = dma.done.wait [#allocation6], 1664  }
   0xf   :  { %389 = vsyncadd [#allocation6], 4294965632  ;;  %v254_v0 = vld [vmem:[#allocation5 + $0x38] sm:$0xff]  ;;  %v253_v1 = vld [vmem:[#allocation5 + $0x30] sm:$0xff]  ;;  %s399_s2 = smov [#allocation8]   ;;  %s191_s5 = sshll.u32 %s444_s3, 4  ;;  %s192_s5 = int_to_ptr.hbm [resolvable:$true] %s191_s5 }
  0x10   :  { %152 = vmatpush.bf16.msra.mxu0 %v254_v0  ;;  %266 = vmatpush.bf16.msra.mxu1 %v254_v0  ;;  %v252_v2 = vld [vmem:[#allocation5 + $0x28] sm:$0xff]  ;;  %v251_v3 = vld [vmem:[#allocation5 + $0x20] sm:$0xff]  ;;  %v250_v4 = vld [vmem:[#allocation5 + $0x18] sm:$0xff]  ;;  %s189_s29 = sshll.u32 %s399_s2, 4  ;;  %s190_s29 = int_to_ptr.vmem [resolvable:$true] %s189_s29 }
  0x11   :  { %267 = vmatpush.bf16.msra.mxu2 %v254_v0  ;;  %v249_v5 = vld [vmem:[#allocation5 + $0x10] sm:$0xff]  ;;  %v248_v6 = vld [vmem:[#allocation5 + $0x8] sm:$0xff]  ;;  %v66_v7 = vld [vmem:[#allocation2 + $0x10] sm:$0x1] }
  0x12   :  { %v247_v8 = vld [vmem:[#allocation5] sm:$0xff]  ;;  %v97_v9 = vunpack.c.l.b16 %v66_v7  ;;  %v245_v10 = vld [vmem:[#allocation2] sm:$0xff]  ;;  %v246_v11 = vld [vmem:[#allocation2 + $0x8] sm:$0xff] }
  0x13   :  { %v83_v15 = vld [vmem:[#allocation7] sm:$0xff]  ;;  %v85_v17 = vld [vmem:[#allocation7 + $0x10] sm:$0xff]  ;;  %v84_v18 = vld [vmem:[#allocation7 + $0x8] sm:$0xff] }
  0x14   :  { %153 = vmatpush.bf16.msra.mxu0 %v253_v1  ;;  %268 = vmatpush.bf16.msra.mxu1 %v253_v1  ;;  %v100_v12 = vpack.c.b16 %v97_v9, %v97_v9  ;;  %v87_v16 = vld [vmem:[#allocation7 + $0x20] sm:$0x3]  ;;  %v86_v19 = vld [vmem:[#allocation7 + $0x18] sm:$0xff] }
  0x15   :  { %269 = vmatpush.bf16.msra.mxu2 %v253_v1 }
  0x18   :  { %154 = vmatpush.bf16.msra.mxu0 %v252_v2  ;;  %270 = vmatpush.bf16.msra.mxu1 %v252_v2 }
  0x19   :  { %271 = vmatpush.bf16.msra.mxu2 %v252_v2 }
  0x1c   :  { %155 = vmatpush.bf16.msra.mxu0 %v251_v3  ;;  %272 = vmatpush.bf16.msra.mxu1 %v251_v3 }
  0x1d   :  { %273 = vmatpush.bf16.msra.mxu2 %v251_v3 }
  0x20   :  { %156 = vmatpush.bf16.msra.mxu0 %v250_v4  ;;  %274 = vmatpush.bf16.msra.mxu1 %v250_v4 }
  0x21   :  { %275 = vmatpush.bf16.msra.mxu2 %v250_v4 }
  0x24   :  { %157 = vmatpush.bf16.msra.mxu0 %v249_v5  ;;  %276 = vmatpush.bf16.msra.mxu1 %v249_v5 }
  0x25   :  { %277 = vmatpush.bf16.msra.mxu2 %v249_v5 }
  0x28   :  { %158 = vmatpush.bf16.msra.mxu0 %v248_v6  ;;  %278 = vmatpush.bf16.msra.mxu1 %v248_v6 }
  0x29   :  { %279 = vmatpush.bf16.msra.mxu2 %v248_v6 }
  0x2c   :  { %159 = vmatpush.bf16.msra.mxu0 %v247_v8  ;;  %280 = vmatpush.bf16.msra.mxu1 %v247_v8 }
  0x2d   :  { %281 = vmatpush.bf16.msra.mxu2 %v247_v8 }
  0x2f   :  { %160 = vmatmul.bf16.vlgmr.msra.gmra.mxu0 %v245_v10  ;;  %165 = vmatmul.bf16.vlgmr.msra.gmra.mxu1 %v246_v11 }
  0x30   :  { %170 = vmatmul.bf16.vlgmr.msra.gmra.mxu2 %v100_v12 }
  0xac   :  { %v161_v13 = vpop.f32.mrf.mxu0  ;;  %v166_v14 = vpop.f32.mrf.mxu1 }
  0xad   :  { %v162_v24 = vadd.f32 %v161_v13, %v83_v15  ;;  %v167_v25 = vadd.f32 %v166_v14, %v85_v17 }
  0xb3   :  { %v171_v20 = vpop.f32.mrf.mxu2 }
  0xb4   :  { %v172_v21 = vadd.f32 %v171_v20, %v87_v16  ;;  %v163_v22 = vpop.f32.mrf.mxu0  ;;  %v168_v23 = vpop.f32.mrf.mxu1 }
  0xb5   :  { %v164_v26 = vadd.f32 %v163_v22, %v84_v18  ;;  %v169_v27 = vadd.f32 %v168_v23, %v86_v19 }
  0xb6   :  { %v179_v28 = vpack.c.bf16 %v172_v21, %v172_v21 }
  0xb7   :  { %v258_v29 = vpack.c.bf16 %v164_v26, %v162_v24  ;;  %v263_v30 = vpack.c.bf16 %v169_v27, %v167_v25 }
  0xb8   :  { %184 = vst [vmem:[#allocation8 + $0x10] sm:$0x1] %v179_v28 }
  0xb9   :  { %259 = vst [vmem:[#allocation8] sm:$0xff] %v258_v29  }
  0xba   :  { %265 = vst [vmem:[#allocation8 + $0x8] sm:$0xff] %v263_v30  }
  0xbb   :  { %v173_v31 = vpop.f32.mrf.mxu2  ;;  %197 = dma.vmem_to_hbm [thread:$0]  %s190_s29, 320, %s192_s5, [#allocation4], %s393_s20, %s393_s20, %s394_s21  }
  0xbc   :  { %390 = dma.done.wait [#allocation4], 320  }
  0xbd   :  { %391 = vsyncadd [#allocation4], 4294966976 }
  0xbe   :  { %202 = vsyncpa [#allocation3], 1 }
  0xbf   :  { %203 = vsyncpa [#allocation6], 1 }
  0xc0   :  { %204 = vsyncpa [#allocation4], 1 }

</bundles_post_ra>
